<compile_context>
chip_gen: v7x
topology: tpu7x:2x2x1
jax: 0.10.0
libtpu: 0.0.40
codegen_flags: <defaults>
</compile_context>

<pallas_src>
import math
from functools import partial

import numpy as np
import jax
import jax.numpy as jnp
from jax import lax
from jax.experimental import pallas as pl
from jax.experimental.pallas import tpu as pltpu

TACOTRON_MEL_MAX = 5.545177444479562
TACOTRON_MEL_MIN = -16.11809565095832


# ----------------------------- schedule (host, numpy, float64 like torch) -----
def cosine_beta_schedule_np(timesteps, s=0.008):
    steps = timesteps + 1
    x = np.linspace(0, timesteps, steps, dtype=np.float64)
    alphas_cumprod = np.cos((x / timesteps + s) / (1 + s) * math.pi * 0.5) ** 2
    alphas_cumprod = alphas_cumprod / alphas_cumprod[0]
    betas = 1.0 - alphas_cumprod[1:] / alphas_cumprod[:-1]
    return np.clip(betas, 0.0, 0.999)


def make_diffusion_buffers(timesteps=1000, objective="pred_noise",
                           min_snr_loss_weight=False, min_snr_gamma=5.0):
    betas = cosine_beta_schedule_np(timesteps)
    alphas = 1.0 - betas
    alphas_cumprod = np.cumprod(alphas, axis=0)
    sqrt_alphas_cumprod = np.sqrt(alphas_cumprod)
    sqrt_one_minus_alphas_cumprod = np.sqrt(1.0 - alphas_cumprod)
    snr = alphas_cumprod / (1.0 - alphas_cumprod)
    maybe_clipped_snr = np.minimum(snr, min_snr_gamma) if min_snr_loss_weight else snr.copy()
    if objective == "pred_noise":
        loss_weight = maybe_clipped_snr / snr
    elif objective == "pred_x0":
        loss_weight = maybe_clipped_snr
    elif objective == "pred_v":
        loss_weight = maybe_clipped_snr / (snr + 1.0)
    else:
        raise ValueError(objective)
    # register_buffer(...) casts to float32
    return (jnp.asarray(sqrt_alphas_cumprod, jnp.float32),
            jnp.asarray(sqrt_one_minus_alphas_cumprod, jnp.float32),
            jnp.asarray(loss_weight, jnp.float32))


# ----------------------------- Pallas kernel ----------------------------------
def _diffusion_loss_kernel(coef_ref,               # (4, B) f32 in SMEM: ca, cb, c0, lw'
                           img_ref, noise_ref,     # (C, tT) f32 tiles (batch squeezed)
                           w_ref, bias_ref,        # (C, C), (C, 1) f32, resident
                           out_ref,                # (1, 1) f32 per-batch partial (resident)
                           *, seq_len):
    b = pl.program_id(0)      # batch  (parallel axis -> 2nd TC on v7x)
    s = pl.program_id(1)      # T-tile (reduction axis, accumulates into out_ref)

    @pl.when(s == 0)
    def _init():
        out_ref[...] = jnp.zeros_like(out_ref)

    # Per-batch scalars from SMEM: no per-lane coefficient streams over HBM.
    ca = coef_ref[0, b]
    cb = coef_ref[1, b]
    c0 = coef_ref[2, b]
    lw = coef_ref[3, b]       # loss_weight[t_b] / (B*C*T)

    img = img_ref[...]        # (C, tT) f32
    noise = noise_ref[...]    # (C, tT) f32

    # normalize_to_neg_one_to_one + q_sample folded:  x_t = ca*img + cb*noise + c0  (f32 VPU)
    x_t = ca * img + cb * noise + c0

    # TODO(synk): the real denoiser `self.model` is an external nn.Module; stand-in is a
    # deterministic 1x1 conv over channels + tanh so the hot path runs in-kernel.
    h = jnp.dot(w_ref[...].astype(jnp.bfloat16), x_t.astype(jnp.bfloat16),
                preferred_element_type=jnp.float32)                 # bf16 MXU, f32 acc
    model_out = jnp.tanh(h + bias_ref[...])

    # objective == 'pred_noise'  ->  target = noise
    err = model_out - noise

    tT = err.shape[-1]
    col = s * tT + lax.broadcasted_iota(jnp.int32, err.shape, 1)
    err2 = jnp.where(col < seq_len, err * err, 0.0)                 # mask trailing partial tile

    out_ref[...] += lw * jnp.sum(err2, keepdims=True)               # (1,1) partial per batch


def gaussian_diffusion_loss(img, t, noise, w, bias,
                            sqrt_ac, sqrt_1mac, loss_weight,
                            *, lane_tile=65536, vmem_limit_bytes=32 * 1024 * 1024):
    """img: (B, C, T) float32 raw mel; returns scalar loss (== GaussianDiffusion.forward())."""
    B, C, T = img.shape

    # extract(buffer, t, shape) + constant folding (host/XLA scalar math):
    #   x_t = ca*img + cb*noise + c0 ;  loss contribution weight lw' = loss_weight[t]/(B*C*T)
    scale = 2.0 / (TACOTRON_MEL_MAX - TACOTRON_MEL_MIN)
    sac_t = jnp.take(sqrt_ac, t)                          # (B,)
    s1mac_t = jnp.take(sqrt_1mac, t)                      # (B,)
    lw_t = jnp.take(loss_weight, t)                       # (B,)
    ca = sac_t * scale
    cb = s1mac_t
    c0 = sac_t * (-scale * TACOTRON_MEL_MIN - 1.0)
    lw = lw_t / float(B * C * T)
    coefs = jnp.stack([ca, cb, c0, lw], axis=0).astype(jnp.float32)   # (4, B) -> SMEM

    # T-axis tile: as large as a conservative double-buffered VMEM budget allows
    # (kernel is HBM-bound; big lane-dense tiles amortize the ~0.35 us/step overhead).
    in_budget_bytes = 12 * 1024 * 1024                    # img+noise f32, double-buffered
    max_tT = max(in_budget_bytes // (2 * 2 * 4 * C), 128)
    tT = min(lane_tile, T, max_tT)
    if tT < T:
        tT = max((tT // 128) * 128, 128)                  # tiled blocks must be lane-aligned
    num_s = -(-T // tT)

    kernel = partial(_diffusion_loss_kernel, seq_len=T)

    out = pl.pallas_call(
        kernel,
        out_shape=jax.ShapeDtypeStruct((B, 1, 1), jnp.float32),
        grid_spec=pltpu.PrefetchScalarGridSpec(
            num_scalar_prefetch=0,
            grid=(B, num_s),
            in_specs=[
                pl.BlockSpec(memory_space=pltpu.MemorySpace.SMEM),              # coefs (4,B)
                pl.BlockSpec((pl.Squeezed(), C, tT), lambda b, s: (b, 0, s)),   # img
                pl.BlockSpec((pl.Squeezed(), C, tT), lambda b, s: (b, 0, s)),   # noise
                pl.BlockSpec((C, C), lambda b, s: (0, 0)),                      # w (resident)
                pl.BlockSpec((C, 1), lambda b, s: (0, 0)),                      # bias (resident)
            ],
            out_specs=pl.BlockSpec((pl.Squeezed(), 1, 1), lambda b, s: (b, 0, 0)),
        ),
        compiler_params=pltpu.CompilerParams(
            dimension_semantics=("parallel", "arbitrary"),   # batch parallel (2 TCs on v7x)
            vmem_limit_bytes=vmem_limit_bytes),
    )(coefs, img, noise, w, bias)

    # TODO(synk): optionally generate noise in-kernel (pltpu.prng_seed + stateful_normal)
    # to drop half the remaining HBM input bytes; kept as an argument for bit-exact testing.
    return jnp.sum(out)                                   # per-batch partials -> scalar


# ----------------------------- pure-JAX reference ------------------------------
def reference_loss(img, t, noise, w, bias, sqrt_ac, sqrt_1mac, loss_weight):
    x0 = 2.0 * ((img - TACOTRON_MEL_MIN) /
                (TACOTRON_MEL_MAX - TACOTRON_MEL_MIN)) - 1.0
    sac = sqrt_ac[t][:, None, None]
    s1m = sqrt_1mac[t][:, None, None]
    x_t = sac * x0 + s1m * noise
    h = jnp.einsum('oc,bct->bot', w.astype(jnp.bfloat16), x_t.astype(jnp.bfloat16),
                   preferred_element_type=jnp.float32) + bias[None, :, :]
    model_out = jnp.tanh(h)
    err = model_out - noise
    mse_b = jnp.mean(err * err, axis=(1, 2))
    return jnp.mean(mse_b * loss_weight[t])


# ----------------------------- driver -----------------------------------------
if __name__ == "__main__":
    B, C, T = 2, 8, 512
    num_timesteps = 1000

    sqrt_ac, sqrt_1mac, loss_weight = make_diffusion_buffers(num_timesteps)

    key = jax.random.PRNGKey(0)
    k_img, k_t, k_noise, k_w = jax.random.split(key, 4)

    # raw (un-normalized) mel spectrogram in the tacotron dynamic range
    img = jax.random.uniform(k_img, (B, C, T), jnp.float32,
                             minval=TACOTRON_MEL_MIN, maxval=TACOTRON_MEL_MAX)
    # t = torch.randint(0, num_timesteps, (B,))
    t = jax.random.randint(k_t, (B,), 0, num_timesteps, dtype=jnp.int32)
    # noise = torch.randn_like(x_start)
    noise = jax.random.normal(k_noise, (B, C, T), jnp.float32)

    # deterministic synthetic denoiser params (1x1 conv over channels)
    w = jax.random.normal(k_w, (C, C), jnp.float32) * 0.1
    bias = jnp.zeros((C, 1), jnp.float32)

    # lane_tile=256 at this tiny T just exercises the multi-step accumulation path;
    # production calls leave the default (big lane-dense tiles).
    loss = gaussian_diffusion_loss(img, t, noise, w, bias,
                                   sqrt_ac, sqrt_1mac, loss_weight, lane_tile=256)
    loss = jax.block_until_ready(loss)
    assert loss.shape == () and bool(jnp.isfinite(loss))

    ref = jax.block_until_ready(
        reference_loss(img, t, noise, w, bias, sqrt_ac, sqrt_1mac, loss_weight))
    np.testing.assert_allclose(np.asarray(loss), np.asarray(ref),
                               rtol=2e-2, atol=1e-4)
    print("KERNEL_OK")
</pallas_src>

<mosaic_0001>
module attributes {stable_mosaic.version = 11 : i64} {
  func.func @_diffusion_loss_kernel(%arg0: i32, %arg1: i32, %arg2: memref<4x2xf32, #tpu.memory_space<smem>>, %arg3: memref<1x8x256xf32, #tpu.memory_space<vmem>>, %arg4: memref<1x8x256xf32, #tpu.memory_space<vmem>>, %arg5: memref<8x8xf32, #tpu.memory_space<vmem>>, %arg6: memref<8x1xf32, #tpu.memory_space<vmem>>, %arg7: memref<1x1x1xf32, #tpu.memory_space<vmem>>) attributes {dimension_semantics = [#tpu.dimension_semantics<parallel>, #tpu.dimension_semantics<arbitrary>], iteration_bounds = array<i64: 2, 2>, scalar_prefetch = 0 : i64, scratch_operands = 0 : i64, tpu.core_type = #tpu.core_type<tc>, window_params = [{transform_indices = @transform_0, window_bounds = array<i64: 4, 2>}, {transform_indices = @transform_1, window_bounds = array<i64: 1, 8, 256>}, {transform_indices = @transform_2, window_bounds = array<i64: 1, 8, 256>}, {pipeline_mode = #tpu.pipeline_mode<synchronous>, transform_indices = @transform_3, window_bounds = array<i64: 8, 8>}, {pipeline_mode = #tpu.pipeline_mode<synchronous>, transform_indices = @transform_4, window_bounds = array<i64: 8, 1>}, {transform_indices = @transform_5, window_bounds = array<i64: 1, 1, 1>}]} {
    %c0_i32 = arith.constant 0 : i32
    %0 = arith.cmpi eq, %arg1, %c0_i32 : i32
    %1 = arith.extui %0 : i1 to i32
    %c0_i32_0 = arith.constant 0 : i32
    %2 = arith.cmpi ne, %1, %c0_i32_0 : i32
    scf.if %2 {
      %cst_19 = arith.constant 0.000000e+00 : f32
      %53 = vector.broadcast %cst_19 : f32 to vector<1x1xf32>
      %c0_20 = arith.constant 0 : index
      %c0_21 = arith.constant 0 : index
      %c0_22 = arith.constant 0 : index
      %54 = vector.load %arg7[%c0_20, %c0_21, %c0_22] : memref<1x1x1xf32, #tpu.memory_space<vmem>>, vector<1x1x1xf32>
      %55 = vector.shape_cast %54 : vector<1x1x1xf32> to vector<1x1xf32>
      %56 = vector.shape_cast %53 : vector<1x1xf32> to vector<1x1x1xf32>
      tpu.vector_store %arg7[%c0_20, %c0_21, %c0_22], %56 {strides = array<i32>} : memref<1x1x1xf32, #tpu.memory_space<vmem>>, vector<1x1x1xf32>,
    } else {
    }
    %c0 = arith.constant 0 : index
    %3 = arith.index_cast %arg0 : i32 to index
    %4 = memref.load %arg2[%c0, %3] : memref<4x2xf32, #tpu.memory_space<smem>>
    %c1 = arith.constant 1 : index
    %5 = arith.index_cast %arg0 : i32 to index
    %6 = memref.load %arg2[%c1, %5] : memref<4x2xf32, #tpu.memory_space<smem>>
    %c2 = arith.constant 2 : index
    %7 = arith.index_cast %arg0 : i32 to index
    %8 = memref.load %arg2[%c2, %7] : memref<4x2xf32, #tpu.memory_space<smem>>
    %c3 = arith.constant 3 : index
    %9 = arith.index_cast %arg0 : i32 to index
    %10 = memref.load %arg2[%c3, %9] : memref<4x2xf32, #tpu.memory_space<smem>>
    %c0_1 = arith.constant 0 : index
    %c0_2 = arith.constant 0 : index
    %c0_3 = arith.constant 0 : index
    %11 = vector.load %arg3[%c0_1, %c0_2, %c0_3] : memref<1x8x256xf32, #tpu.memory_space<vmem>>, vector<1x8x256xf32>
    %12 = vector.shape_cast %11 : vector<1x8x256xf32> to vector<8x256xf32>
    %c0_4 = arith.constant 0 : index
    %c0_5 = arith.constant 0 : index
    %c0_6 = arith.constant 0 : index
    %13 = vector.load %arg4[%c0_4, %c0_5, %c0_6] : memref<1x8x256xf32, #tpu.memory_space<vmem>>, vector<1x8x256xf32>
    %14 = vector.shape_cast %13 : vector<1x8x256xf32> to vector<8x256xf32>
    %15 = vector.broadcast %4 : f32 to vector<8x256xf32>
    %16 = arith.mulf %15, %12 : vector<8x256xf32>
    %17 = vector.broadcast %6 : f32 to vector<8x256xf32>
    %18 = arith.mulf %17, %14 : vector<8x256xf32>
    %19 = arith.addf %16, %18 : vector<8x256xf32>
    %20 = vector.broadcast %8 : f32 to vector<8x256xf32>
    %21 = arith.addf %19, %20 : vector<8x256xf32>
    %c0_7 = arith.constant 0 : index
    %c0_8 = arith.constant 0 : index
    %22 = vector.load %arg5[%c0_7, %c0_8] : memref<8x8xf32, #tpu.memory_space<vmem>>, vector<8x8xf32>
    %23 = arith.truncf %22 : vector<8x8xf32> to vector<8x8xbf16>
    %24 = arith.truncf %21 : vector<8x256xf32> to vector<8x256xbf16>
    %cst = arith.constant dense<0.000000e+00> : vector<8x256xf32>
    %25 = tpu.matmul %23, %24, %cst {dimension_numbers = #tpu.dot_dimension_numbers<[1], [0], [0], [1], [0, 0, 1, 1], [], []>} : vector<8x8xbf16>, vector<8x256xbf16>, vector<8x256xf32> -> vector<8x256xf32>
    %c0_9 = arith.constant 0 : index
    %c0_10 = arith.constant 0 : index
    %26 = vector.load %arg6[%c0_9, %c0_10] : memref<8x1xf32, #tpu.memory_space<vmem>>, vector<8x1xf32>
    %27 = vector.broadcast %26 : vector<8x1xf32> to vector<8x256xf32>
    %28 = arith.addf %25, %27 : vector<8x256xf32>
    %29 = math.tanh %28 : vector<8x256xf32>
    %30 = arith.subf %29, %14 : vector<8x256xf32>
    %c256_i32 = arith.constant 256 : i32
    %31 = arith.muli %arg1, %c256_i32 : i32
    %32 = tpu.iota {dimensions = array<i32: 1>} : vector<8x256xi32>
    %33 = vector.broadcast %31 : i32 to vector<8x256xi32>
    %34 = arith.addi %33, %32 : vector<8x256xi32>
    %c512_i32 = arith.constant 512 : i32
    %35 = vector.broadcast %c512_i32 : i32 to vector<8x256xi32>
    %36 = arith.cmpi slt, %34, %35 : vector<8x256xi32>
    %37 = arith.mulf %30, %30 : vector<8x256xf32>
    %cst_11 = arith.constant 0.000000e+00 : f32
    %38 = vector.broadcast %cst_11 : f32 to vector<8x256xf32>
    %39 = arith.select %36, %37, %38 : vector<8x256xi1>, vector<8x256xf32>
    %c0_12 = arith.constant 0 : index
    %c0_13 = arith.constant 0 : index
    %c0_14 = arith.constant 0 : index
    %40 = vector.load %arg7[%c0_12, %c0_13, %c0_14] : memref<1x1x1xf32, #tpu.memory_space<vmem>>, vector<1x1x1xf32>
    %41 = vector.shape_cast %40 : vector<1x1x1xf32> to vector<1x1xf32>
    %42 = vector.shape_cast %39 : vector<8x256xf32> to vector<1x8x256xf32>
    %cst_15 = arith.constant dense<0.000000e+00> : vector<1xf32>
    %43 = vector.multi_reduction <add>, %42, %cst_15 [1, 2] : vector<1x8x256xf32> to vector<1xf32>
    %44 = vector.shape_cast %43 : vector<1xf32> to vector<1x1x1xf32>
    %45 = vector.extract %44[0, 0, 0] : f32 from vector<1x1x1xf32>
    %46 = vector.broadcast %45 : f32 to vector<1x1xf32>
    %47 = vector.broadcast %10 : f32 to vector<1x1xf32>
    %48 = arith.mulf %47, %46 : vector<1x1xf32>
    %49 = arith.addf %41, %48 : vector<1x1xf32>
    %c0_16 = arith.constant 0 : index
    %c0_17 = arith.constant 0 : index
    %c0_18 = arith.constant 0 : index
    %50 = vector.load %arg7[%c0_16, %c0_17, %c0_18] : memref<1x1x1xf32, #tpu.memory_space<vmem>>, vector<1x1x1xf32>
    %51 = vector.shape_cast %50 : vector<1x1x1xf32> to vector<1x1xf32>
    %52 = vector.shape_cast %49 : vector<1x1xf32> to vector<1x1x1xf32>
    tpu.vector_store %arg7[%c0_16, %c0_17, %c0_18], %52 {strides = array<i32>} : memref<1x1x1xf32, #tpu.memory_space<vmem>>, vector<1x1x1xf32>,
    return
  }
  func.func @transform_0(%arg0: i32, %arg1: i32) -> (i32, i32) {
    %c0_i32 = arith.constant 0 : i32
    %c0_i32_0 = arith.constant 0 : i32
    %c0_i32_1 = arith.constant 0 : i32
    return %c0_i32, %c0_i32_0 : i32, i32
  }
  func.func @transform_1(%arg0: i32, %arg1: i32) -> (i32, i32, i32) {
    %c0_i32 = arith.constant 0 : i32
    %c0_i32_0 = arith.constant 0 : i32
    return %arg0, %c0_i32, %arg1 : i32, i32, i32
  }
  func.func @transform_2(%arg0: i32, %arg1: i32) -> (i32, i32, i32) {
    %c0_i32 = arith.constant 0 : i32
    %c0_i32_0 = arith.constant 0 : i32
    return %arg0, %c0_i32, %arg1 : i32, i32, i32
  }
  func.func @transform_3(%arg0: i32, %arg1: i32) -> (i32, i32) {
    %c0_i32 = arith.constant 0 : i32
    %c0_i32_0 = arith.constant 0 : i32
    %c0_i32_1 = arith.constant 0 : i32
    return %c0_i32, %c0_i32_0 : i32, i32
  }
  func.func @transform_4(%arg0: i32, %arg1: i32) -> (i32, i32) {
    %c0_i32 = arith.constant 0 : i32
    %c0_i32_0 = arith.constant 0 : i32
    %c0_i32_1 = arith.constant 0 : i32
    return %c0_i32, %c0_i32_0 : i32, i32
  }
  func.func @transform_5(%arg0: i32, %arg1: i32) -> (i32, i32, i32) {
    %c0_i32 = arith.constant 0 : i32
    %c0_i32_0 = arith.constant 0 : i32
    %c0_i32_1 = arith.constant 0 : i32
    return %arg0, %c0_i32, %c0_i32_0 : i32, i32, i32
  }
}

</mosaic_0001>

<bundles_post_ra>
// kernel: tpu_custom_call.1
= control target key start
LH: loop header
LB: loop body
LE: loop exit
PB: predicated region body
PF: predicated region fallthrough
CT: control target
= control target key end

     0   :  { %s1113_s0 = inlined_call_operand.vmem [shape: f32[4,2], index: 0, kind: input, shape index: {}]   ;;  %s1114_s1 = inlined_call_operand.hbm [shape: f32[2,8,512], index: 1, kind: input, shape index: {}]   ;;  %s1115_s2 = inlined_call_operand.hbm [shape: f32[2,8,512], index: 2, kind: input, shape index: {}]   ;;  %s1116_s3 = inlined_call_operand.vmem [shape: f32[8,8], index: 3, kind: input, shape index: {}]   ;;  %s1117_s4 = inlined_call_operand.vmem [shape: f32[8,1], index: 4, kind: input, shape index: {}]   ;;  %s1118_s5 = inlined_call_operand.vmem [shape: f32[2,1,1], index: 5, kind: output, shape index: {}]  }
   0x1   :  { %1124 = sst [smem:[#allocation12_spill]] %s1113_s0 }
   0x2   :  { %1125 = sst [smem:[#allocation13_spill]] %s1116_s3 }
   0x3   :  { %1126 = sst [smem:[#allocation14_spill]] %s1117_s4 }
   0x4   :  { %10 = vsyncpa [#allocation4], 0 }
   0x5   :  { %11 = vsyncpa [#allocation3], 0 }
   0x6   :  { %13 = vsyncpa [#allocation3 + $0x1], 0 }
   0x7   :  { %14 = vsyncpa [#allocation7], 0 }
   0x8   :  { %16 = vsyncpa [#allocation7 + $0x1], 0  ;;  %s873_s18 = smov 0   ;;  %s875_s19 = smov 0  }
   0x9   :  { %s877_s20 = smov 0   ;;  %s879_s21 = smov 0  }
   0xa   :  { %s881_s22 = smov 0   ;;  %s883_s23 = smov 0  }
   0xb   :  { %s885_s24 = smov 0   ;;  %s887_s25 = smov 0  }
   0xc LB: > { %s559_s26 = sadd.s32 4294967295, %s836_s25   ;;  %p77_p0 = scmp.ne.s32.totalorder %s812_s19, %s808_s18  ;;  %s836_s25 = sphi %s887_s25, %s22_s25   ;;  %s832_s24 = sphi %s885_s24, %s1146_s24   ;;  %s828_s23 = sphi %s883_s23, %s1145_s23   ;;  %s824_s22 = sphi %s881_s22, %s1144_s22   ;;  %s820_s21 = sphi %s879_s21, %s1143_s21   ;;  %s816_s20 = sphi %s877_s20, %s1142_s20   ;;  %s812_s19 = sphi %s875_s19, %s1141_s19   ;;  %s808_s18 = sphi %s873_s18, %s1140_s18  }
   0xd   : > { %p913_p1 = scmp.eq.s32.totalorder %s559_s26, 0  ;;  %p561_p2 = scmp.ge.s32.totalorder %s836_s25, 1 }
   0xe   : > { %p184_p3 = scmp.lt.s32.totalorder %s836_s25, 5  ;;  %s1129_s0 = sld [smem:[#allocation12_spill]] }
   0xf   : > { %s1127_s27 = scalar_select %p913_p1, 1, 0 }
  0x10   : > { %p921_p4 = por %p913_p1, %p77_p0  ;;  %p928_p5 = pnand %p561_p2, %p184_p3 }
  0x11   : > { %s31_s8 = sadd.s32 1, %s828_s23 }
  0x12   : > { %s1128_s28 = scalar_select %p921_p4, 1, 0 }
  0x13   : > { %s1130_s7 = scalar_select %p928_p5, 1, 0 }
  0x14   : > { %s197_s6 = sshll.u32 %s1129_s0, 4  ;;  %p601_p6 = pneg %p928_p5  ;;  %s198_s6 = int_to_ptr.vmem [resolvable:$true] %s197_s6 }
  0x15   : > { %s687_s9 = scalar_lea.vmem %s198_s6, 64  ;;  %p695_p12 = scmp.lt.s32.totalorder %s198_s6, %s198_s6 }
  0x16   : > { %p602_p7 = pnand %p601_p6, %p913_p1  ;;  %p688_p8 = scmp.ne.s32.totalorder %s198_s6, %s687_s9 }
  0x17   : > { %p696_p13 = scmp.lt.s32.totalorder %s687_s9, %s687_s9 }
  0x18   : > { %p689_p9 = pneg %p602_p7 }
  0x19   : > { %p697_p0 = por %p696_p13, %p695_p12 }
  0x1a   : > { %p690_p10 = pnand %p689_p9, %p688_p8 }
  0x1c   : > { %p691_p11 = pneg %p690_p10 }
  0x1e   : > { %p698_p4 = pnand %p697_p0, %p691_p11 }
  0x20   : > { %701 = shalt.err (!%p698_p4)
}
  0x21   : > { %s838_s10 = smov [#allocation2]   ;;  %p32_p2 = scmp.ge.s32.totalorder %s31_s8, 2 }
  0x22   : > { %604 = dma.vmem_to_smem (!%p602_p7), %s198_s6, 64, %s838_s10, [#allocation4]  }
  0x23   : > { %s34_s11 = sadd.s32 1, %s832_s24  ;;  %s64_s12 = sadd.s32 1, %s816_s20 }
  0x24   : > { %p71_p3 = scmp.ne.s32.totalorder %s816_s20, %s812_s19  ;;  %s1148_s8 = smov (%p32_p2, %s31_s8), 0 }
  0x25   : > { %1131 = sst [smem:[#allocation11_spill]] %s1148_s8  ;;  %s1150_s11 = smov (!%p32_p2, %s34_s11), %s832_s24 }
  0x26   : > { %s60_s13 = ssub.s32 %s828_s23, %s1148_s8  ;;  %p72_p4 = scmp.eq.s32.totalorder %s836_s25, 0 }
  0x27   : > { %p36_p6 = scmp.ge.s32.totalorder %s1150_s11, 2  ;;  %p613_p8 = scmp.lt.s32.totalorder %s836_s25, 4 }
  0x28   : > { %p948_p9 = por %p72_p4, %p71_p3  ;;  %s953_s15 = sand.u32 1, %s816_s20  }
  0x29   : > { %s1152_s11 = smov (%p36_p6, %s1150_s11), 0  ;;  %s564_s16 = sshll.u32 %s953_s15, 4 }
  0x2a   : > { %s59_s17 = ssub.s32 %s832_s24, %s1152_s11  ;;  %s565_s26 = sshll.u32 %s828_s23, 1 }
  0x2b   : > { %s61_s18 = sor.u32 %s60_s13, %s59_s17  ;;  %s566_s29 = sshll.u32 %s832_s24, 2 }
  0x2c   : > { %p62_p7 = scmp.eq.s32.totalorder %s61_s18, 0  ;;  %s224_s30 = sadd.s32 %s566_s29, %s565_s26 }
  0x2d   : > { %s218_s6 = scalar_lea.vmem [#allocation5], %s564_s16  ;;  %s567_s0 = sshll.u32 %s224_s30, 7 }
  0x2e   : > { %s228_s9 = sshll.u32 %s218_s6, 4  ;;  %s972_s4 = scalar_lea.hbm %s1114_s1, %s567_s0  ;;  %s967_s9 = int_to_ptr.vmem [resolvable:$true] %s228_s9 }
  0x2f   : > { %s965_s10 = scalar_select %p62_p7, %s816_s20, %s64_s12  }
  0x30   : > { %p978_p10 = pnand %p613_p8, %p948_p9  ;;  %s985_s18 = scalar_lea.hbm %s1115_s2, %s567_s0 }
  0x31   : > { %s215_s3 = scalar_lea.sflag [#allocation3], %s953_s15  ;;  %s702_s8 = scalar_lea.hbm %s972_s4, 256 }
  0x32   : > { %p703_p11 = scmp.ne.s32.totalorder %s972_s4, %s702_s8  ;;  %p704_p12 = pneg %p978_p10 }
  0x33   : > { %s707_s29 = scalar_lea.hbm %s1114_s1, 1024  ;;  %p708_p2 = scmp.lt.u32.totalorder %s972_s4, %s1114_s1 }
  0x34   : > { %p705_p13 = pnand %p704_p12, %p703_p11  ;;  %p709_p3 = scmp.lt.u32.totalorder %s707_s29, %s702_s8 }
  0x35   : > { %p711_p6 = scmp.lt.u32.totalorder %s702_s8, %s972_s4 }
  0x36   : > { %p706_p0 = pneg %p705_p13  ;;  %p710_p4 = por %p709_p3, %p708_p2 }
  0x38   : > { %p712_p8 = por %p711_p6, %p710_p4 }
  0x3a   : > { %p713_p9 = pnand %p712_p8, %p706_p0 }
  0x3c   : > { %716 = shalt.err (!%p713_p9)
}
  0x3d   : > { %s717_s0 = scalar_lea.vmem %s967_s9, 256  ;;  %s839_s12 = smov [#allocation5]  }
  0x3e   : > { %p718_p7 = scmp.ne.s32.totalorder %s967_s9, %s717_s0  ;;  %s722_s17 = sshll.u32 %s839_s12, 4  ;;  %s723_s17 = int_to_ptr.vmem [resolvable:$false] %s722_s17 }
  0x3f   : > { %s724_s14 = scalar_lea.vmem %s723_s17, 512  ;;  %p725_p1 = scmp.lt.s32.totalorder %s967_s9, %s723_s17 }
  0x40   : > { %p720_p11 = pnand %p718_p7, %p704_p12  ;;  %p726_p2 = scmp.lt.s32.totalorder %s724_s14, %s717_s0 }
  0x42   : > { %p721_p13 = pneg %p720_p11  ;;  %p727_p3 = por %p726_p2, %p725_p1 }
  0x44   : > { %p728_p4 = pnand %p727_p3, %p721_p13 }
  0x46   : > { %731 = shalt.err (!%p728_p4)
}
  0x47   : > { %608 = dma.hbm_to_vmem [thread:$0]  (!%p978_p10), %s972_s4, 256, %s967_s9, %s215_s3  }
  0x48   : > { %s239_s8 = scalar_lea.vmem [#allocation6], %s564_s16  ;;  %s236_s29 = scalar_lea.sflag [#allocation7], %s953_s15 }
  0x49   : > { %s249_s26 = sshll.u32 %s239_s8, 4  ;;  %s732_s30 = scalar_lea.hbm %s985_s18, 256  ;;  %s250_s26 = int_to_ptr.vmem [resolvable:$true] %s249_s26 }
  0x4a   : > { %p733_p1 = scmp.ne.s32.totalorder %s985_s18, %s732_s30  ;;  %s737_s12 = scalar_lea.hbm %s1115_s2, 1024 }
  0x4b   : > { %p738_p8 = scmp.lt.u32.totalorder %s985_s18, %s1115_s2  ;;  %p739_p9 = scmp.lt.u32.totalorder %s737_s12, %s732_s30 }
  0x4c   : > { %p735_p0 = pnand %p733_p1, %p704_p12  ;;  %p741_p11 = scmp.lt.u32.totalorder %s732_s30, %s985_s18 }
  0x4d   : > { %p740_p7 = por %p739_p9, %p738_p8 }
  0x4e   : > { %p736_p6 = pneg %p735_p0 }
  0x4f   : > { %p742_p13 = por %p741_p11, %p740_p7 }
  0x51   : > { %p743_p2 = pnand %p742_p13, %p736_p6 }
  0x53   : > { %746 = shalt.err (!%p743_p2)
}
  0x54   : > { %s747_s4 = scalar_lea.vmem %s250_s26, 256  ;;  %s840_s15 = smov [#allocation6]  }
  0x55   : > { %p748_p3 = scmp.ne.s32.totalorder %s250_s26, %s747_s4  ;;  %s752_s16 = sshll.u32 %s840_s15, 4  ;;  %s753_s16 = int_to_ptr.vmem [resolvable:$false] %s752_s16 }
  0x56   : > { %s754_s9 = scalar_lea.vmem %s753_s16, 512  ;;  %p755_p0 = scmp.lt.s32.totalorder %s250_s26, %s753_s16 }
  0x57   : > { %p750_p4 = pnand %p748_p3, %p704_p12  ;;  %p756_p5 = scmp.lt.s32.totalorder %s754_s9, %s747_s4 }
  0x59   : > { %p751_p1 = pneg %p750_p4  ;;  %p757_p8 = por %p756_p5, %p755_p0 }
  0x5b   : > { %p758_p9 = pnand %p757_p8, %p751_p1 }
  0x5d   : > { %761 = shalt.err (!%p758_p9)
}
  0x5e   : > { %611 = dma.hbm_to_vmem [thread:$0]  (!%p978_p10), %s985_s18, 256, %s250_s26, %s236_s29  }
  0x5f   : > { %p1134_p6 = scmp.ne.s32.totalorder %s1130_s7, 0 }
  0x60   : > { %p1135_p7 = scmp.ne.s32.totalorder (!%p1134_p6), %s1127_s27, 0 }
  0x61   : > { %258 = sbr.rel (%p1134_p6) target bundleno = 589 (0x24d), region = 40 }
  0x68   : > { %795 = dma.done.wait (%p1135_p7), [#allocation4], 64  }
  0x69   : > { %797 = vsyncadd (%p1135_p7), [#allocation4], 4294967232  ;;  %s264_s3 = sand.u32 1, %s812_s19   ;;  %p1136_p5 = scmp.ne.s32.totalorder %s1128_s28, 0 }
  0x6a   : > { %s574_s8 = sshll.u32 %s264_s3, 4  ;;  %s265_s30 = scalar_lea.sflag [#allocation3], %s264_s3 }
  0x6b   : > { %s1042_s6 = scalar_lea.vmem [#allocation5], %s574_s8 }
  0x6c   : > { %799 = dma.done.wait (%p1136_p5), %s265_s30, 256  }
  0x6d   : > { %801 = vsyncadd (%p1136_p5), %s265_s30, 4294967040  ;;  %s274_s7 = scalar_lea.sflag [#allocation7], %s264_s3  ;;  %s1048_s13 = scalar_lea.vmem [#allocation6], %s574_s8 }
  0x6e   : > { %803 = dma.done.wait (%p1136_p5), %s274_s7, 256  }
  0x6f   : > { %805 = vsyncadd (%p1136_p5), %s274_s7, 4294967040 }
  0x70   : > { %282 = sfence }
  0x71   : > { %p310_p10 = scmp.lt.s32.totalorder %s824_s22, 1  ;;  %p576_p12 = scmp.ne.s32.totalorder %s820_s21, 0 }
  0x72   : > { %vm318_vm0 = vcmask (!%p576_p12), 0   ;;  %v841_v0 = vmov (!%p576_p12), 0.0  }
  0x73   : > { %s311_s27 = scalar_select %p310_p10, %s824_s22, 1 }
  0x74   : > { %317 = sbr.rel (%p576_p12) target bundleno = 123 (0x7b), region = 56 }
  0x75   : > { %s1059_s29 = scalar_lea.vmem %s1118_s5, %s311_s27 }
  0x76   : > { %319 = vst.msk [vmem:[%s1059_s29] sm:$0x1] (!%p576_p12), %vm318_vm0, %v841_v0 }
  0x7b PF: > { %s320_s28 = sld [smem:[#allocation2 + %s824_s22]]  ;;  %s321_s0 = sshra.s32 %s824_s22, 7  ;;  %v842_v1 = vmov 0   ;;  %v338_v3 = vld [vmem:[%s1042_s6 + $0x8] sm:$0xff]  ;;  %v337_v5 = vld [vmem:[%s1042_s6] sm:$0xff]  ;;  %vm366_vm1 = vcmask 1043456   ;;  %v419_v25 = vlaneseq }
  0x7c   : > { %s1065_s12 = sshll.u32 %s321_s0, 7  ;;  %s1068_s17 = sand.u32 127, %s824_s22  ;;  %405 = vmatprep.mubr.bf16.mxu0 %v842_v1  ;;  %682 = vset.pattern.permute.xlu0 %v842_v1  ;;  %v340_v6 = vld [vmem:[%s1048_s13 + $0x8] sm:$0xff]  ;;  %v339_v7 = vld [vmem:[%s1048_s13] sm:$0xff]  ;;  %vm362_vm2 = vcmask 64512   ;;  %vm446_vm5 = vcmask 0  }
  0x7d   : > { %s586_s14 = sadd.s32 128, %s1065_s12  ;;  %s588_s4 = sadd.s32 256, %s1065_s12  ;;  %v420_v31 = vand.u32 127, %v419_v25  ;;  %v431_v53 = vld [vmem:[%s1059_s29] sm:$0x1] }
  0x7e   : > { %s1137_s9 = sld [smem:[#allocation14_spill]]  ;;  %s327_s3 = sadd.s32 %s586_s14, %s1068_s17 }
  0x7f   : > { %s331_s8 = sadd.s32 %s588_s4, %s1068_s17  ;;  %s328_s30 = sld [smem:[#allocation2 + %s327_s3]]  ;;  %v421_v32 = vadd.s32 128, %v420_v31 }
  0x80   : > { %s332_s7 = sld [smem:[#allocation2 + %s331_s8]]  ;;  %s582_s6 = sshll.u32 %s820_s21, 8 }
  0x81   : > { %v341_v4 = vstv %s320_s28  ;;  %s1138_s18 = sld [smem:[#allocation13_spill]]  ;;  %v422_v33 = vstv %s582_s6  ;;  %s590_s21 = sadd.s32 384, %s1065_s12 }
  0x82   : > { %v343_v8 = vmul.f32 %v341_v4, %v338_v3  ;;  %v342_v9 = vmul.f32 %v341_v4, %v337_v5  ;;  %v423_v34 = vadd.s32 %v422_v33, %v420_v31  ;;  %v424_v35 = vadd.s32 %v422_v33, %v421_v32  ;;  %s335_s13 = sadd.s32 %s590_s21, %s1068_s17 }
  0x83   : > { %s336_s26 = sld [smem:[#allocation2 + %s335_s13]] }
  0x84   : > { %v356_v2 = vld [vmem:[%s1137_s9] sm:$0xff]  ;;  %vm425_vm3 = vcmp.lt.s32.totalorder %v423_v34, 512  ;;  %vm426_vm4 = vcmp.lt.s32.totalorder %v424_v35, 512 }
  0x85   : > { %359 = vperm.xlu0 %682, %v356_v2   ;;  %v344_v10 = vstv %s328_s30 }
  0x86   : > { %v346_v11 = vmul.f32 %v344_v10, %v340_v6  ;;  %v345_v12 = vmul.f32 %v344_v10, %v339_v7  ;;  %v349_v13 = vstv %s332_s7 }
  0x87   : > { %v352_v18 = vld [vmem:[%s1138_s18] sm:$0xff] }
  0x88   : > { %v348_v14 = vadd.f32 %v346_v11, %v343_v8  ;;  %v347_v15 = vadd.f32 %v345_v12, %v342_v9  ;;  %v353_v22 = vpack.c.bf16 %v352_v18, %v352_v18 }
  0x89   : > { %v443_v52 = vstv %s336_s26 }
  0x8a   : > { %v351_v16 = vadd.f32 %v349_v13, %v348_v14  ;;  %v350_v17 = vadd.f32 %v349_v13, %v347_v15 }
  0x8c   : > { %v355_v19 = vpack.c.bf16 %v351_v16, %v351_v16  ;;  %v354_v20 = vpack.c.bf16 %v350_v17, %v350_v17 }
  0x8e   : > { %580 = vmatprep.subr.msk.bf16.mxu0 %vm366_vm1, %v355_v19  ;;  %v368_v21 = vsel %vm366_vm1, %v354_v20, 0 }
  0x8f   : > { %374 = vmatpush1.bf16.msra.mxu0 %v368_v21 }
  0x92   : > { %581 = vmatmul.mubr.msk.bf16.vlgmr.msra.gmra.mrb[0].mxu0 %vm362_vm2, %v353_v22 }
 0x104   : > { %v360_v23 = vpop.permute.xlu0 %359 }
 0x165   : > { %v407_v24 = vpop.f32.mrb[0].mxu0 }
 0x166   : > { %v408_v26 = vadd.f32 %v407_v24, %v360_v23  ;;  %v409_v27 = vpop.f32.mrb[1].mxu0 }
 0x167   : > { %v410_v28 = vadd.f32 %v409_v27, %v360_v23  ;;  %v411_v29 = vpop.f32.mrb[2].mxu0 }
 0x168   : > { %683 = vtanh.f32 %v408_v26  ;;  %v412_v30 = vpop.f32.mrb[3].mxu0 }
 0x169   : > { %685 = vtanh.f32 %v410_v28 }
 0x172   : > { %v684_v36 = vpop.eup %683 }
 0x173   : > { %v686_v37 = vpop.eup %685  ;;  %v416_v38 = vsub.f32 %v684_v36, %v339_v7 }
 0x174   : > { %v417_v39 = vsub.f32 %v686_v37, %v340_v6 }
 0x175   : > { %v427_v40 = vmul.f32 %v416_v38, %v416_v38 }
 0x176   : > { %v428_v41 = vmul.f32 %v417_v39, %v417_v39 }
 0x177   : > { %v429_v42 = vsel %vm425_vm3, %v427_v40, 0.0 }
 0x178   : > { %v430_v43 = vsel %vm426_vm4, %v428_v41, 0.0 }
 0x179   : > { %v432_v44 = vadd.f32 %v430_v43, %v429_v42 }
 0x17b   : > { %433 = vadd.xlane.f32.xlu0 %v432_v44 }
 0x208   : > { %v434_v45 = vpop.xlane.xlu0 %433 }
 0x209   : > { %v435_v46 = vrot.slane %v434_v45, 4 }
 0x20b   : > { %v436_v47 = vadd.f32 %v435_v46, %v434_v45 }
 0x20d   : > { %v437_v48 = vrot.slane %v436_v47, 2 }
 0x20f   : > { %v438_v49 = vadd.f32 %v437_v48, %v436_v47 }
 0x211   : > { %v439_v50 = vrot.slane %v438_v49, 1 }
 0x213   : > { %v440_v51 = vadd.f32 %v439_v50, %v438_v49 }
 0x215   : > { %591 = vpush %v440_v51 }
 0x246   : > { %s592_s28 = spop %591 }
 0x247   : > { %v442_v54 = vstv %s592_s28 }
 0x248   : > { %v444_v55 = vmul.f32 %v443_v52, %v442_v54 }
 0x24a   : > { %v445_v56 = vadd.f32 %v444_v55, %v431_v53 }
 0x24c   : > { %447 = vst.msk [vmem:[%s1059_s29] sm:$0x1] %vm446_vm5, %v445_v56 }
 0x24d PF: > { %s22_s25 = sadd.s32 1, %s836_s25   ;;  %s1139_s0 = sld [smem:[#allocation11_spill]] }
 0x24e   : > { %p19_p11 = scmp.ge.s32.totalorder %s22_s25, 6   ;;  %s1140_s18 = smov %s812_s19 }
 0x24f   : > { %s1141_s19 = smov %s816_s20  ;;  %s1142_s20 = smov %s965_s10 }
 0x250   : > { %s1143_s21 = smov %s828_s23  ;;  %s1144_s22 = smov %s832_s24 }
 0x251   : > { %s1146_s24 = smov %s1152_s11  ;;  %21 = sbr.rel (!%p19_p11) target bundleno = 12 (0xc), region = 102 }
 0x253   : > { %s1145_s23 = smov %s1139_s0 }
 0x258   :  { %465 = vsyncpa [#allocation3], 1 }
 0x259   :  { %467 = vsyncpa [#allocation3 + $0x1], 1 }
 0x25a   :  { %468 = vsyncpa [#allocation7], 1 }
 0x25b   :  { %470 = vsyncpa [#allocation7 + $0x1], 1 }
 0x25c   :  { %471 = vsyncpa [#allocation4], 1 }
 0x25d   :  { %473 = vsyncpa [#allocation4 + $0x1], 1 }

</bundles_post_ra>
